<compile_context>
chip_gen: v5e
topology: v5e:2x2
jax: 0.10.0
libtpu: 0.0.40
codegen_flags: <defaults>
</compile_context>

<pallas_src>
import functools

import jax
import jax.numpy as jnp
from jax.experimental import pallas as pl
from jax.experimental.pallas import tpu as pltpu


def _round_up(n, m):
    return ((n + m - 1) // m) * m


def _agent_kernel(Ipad, BW, GW, OP, x_ref, w_ref, b_ref, out_ref):
    """Whole Agent.forward for one input vector; everything resident in VMEM.

    Weight slab rows:  [0:Ipad] = layer1, [Ipad:Ipad+BW] = layer2,
                       [Ipad+BW:Ipad+2BW] = FC (lanes 0:OP).
    Bias row lanes:    [0:GW] = layer1, [GW:2GW] = layer2, [2GW:2GW+OP] = FC.
    Gate lane layout per layer (GW = 3*BW):
                       block0 = i (fwd|bwd|0pad), block1 = g, block2 = o.
    """

    def lstm_layer(h, w, b):
        g = jnp.dot(h, w, preferred_element_type=jnp.float32) + b     # (1, GW)
        i = jax.nn.sigmoid(g[:, 0:BW])           # vreg-aligned slices only
        c = i * jnp.tanh(g[:, BW:2 * BW])
        o = jax.nn.sigmoid(g[:, 2 * BW:3 * BW])
        # pad lanes: sigmoid(0) * tanh(sigmoid(0) * tanh(0)) == 0 exactly
        return o * jnp.tanh(c)                                        # (1, BW)

    x = x_ref[...]                                                     # (1, Ipad)
    h1 = lstm_layer(x, w_ref[0:Ipad, :], b_ref[:, 0:GW])               # (1, BW)
    h2 = lstm_layer(h1, w_ref[Ipad:Ipad + BW, :], b_ref[:, GW:2 * GW]) # (1, BW)

    # Final Linear. The bias already contains -inf at zero_probs indices and at
    # padded output lanes, so softmax over the full OP-lane slab equals softmax
    # over the first output_size lanes (padded lanes get probability 0).
    logits = (jnp.dot(h2, w_ref[Ipad + BW:Ipad + 2 * BW, 0:OP],
                      preferred_element_type=jnp.float32)
              + b_ref[:, 2 * GW:2 * GW + OP])                          # (1, OP)
    m = jnp.max(logits, axis=1, keepdims=True)
    p = jnp.exp(logits - m)
    out_ref[...] = p / jnp.sum(p, axis=1, keepdims=True)               # softmax, dim=1


def init_agent_params(key, input_size, hidden_size, output_size):
    """Deterministic params matching nn.LSTM(2 layers, bidir) + nn.Linear shapes."""
    H = hidden_size
    k_lstm = 1.0 / float(H) ** 0.5
    k_fc = 1.0 / float(2 * H) ** 0.5

    def u(k, shape, scale):
        return jax.random.uniform(k, shape, jnp.float32, -scale, scale)

    names = []
    for layer in range(2):
        in_dim = input_size if layer == 0 else 2 * H
        for suffix in ("", "_reverse"):
            names.append((f"l{layer}{suffix}", in_dim))

    keys = jax.random.split(key, 4 * len(names) + 2)
    params, ki = {}, 0
    for base, in_dim in names:
        params[f"weight_ih_{base}"] = u(keys[ki], (4 * H, in_dim), k_lstm); ki += 1
        # weight_hh is mathematically unused (h0 == 0) but kept for shape fidelity.
        params[f"weight_hh_{base}"] = u(keys[ki], (4 * H, H), k_lstm); ki += 1
        params[f"bias_ih_{base}"] = u(keys[ki], (4 * H,), k_lstm); ki += 1
        params[f"bias_hh_{base}"] = u(keys[ki], (4 * H,), k_lstm); ki += 1
    params["fc_weight"] = u(keys[ki], (output_size, 2 * H), k_fc); ki += 1
    params["fc_bias"] = u(keys[ki], (output_size,), k_fc)
    return params


def _pack_agent_params(params, input_size, hidden_size, output_size, zero_probs):
    """Fuse every parameter into one weight slab + one bias row, lane-aligned."""
    H = hidden_size
    Ipad = _round_up(max(input_size, 8), 8)
    BW = max(128, _round_up(2 * H, 128))          # hidden/block lane width
    GW = 3 * BW                                   # fused gate width (i, g, o blocks)
    OP = max(128, _round_up(output_size, 128))    # padded output lane width

    def pack_layer(base, in_dim):
        wf = params[f"weight_ih_{base}"]                       # (4H, in_dim) fwd
        wb = params[f"weight_ih_{base}_reverse"]               # (4H, in_dim) bwd
        bf = params[f"bias_ih_{base}"] + params[f"bias_hh_{base}"]
        bb = params[f"bias_ih_{base}_reverse"] + params[f"bias_hh_{base}_reverse"]
        W = jnp.zeros((in_dim, GW), jnp.float32)
        b = jnp.zeros((GW,), jnp.float32)
        # torch gate row order is (i, f, g, o); f is dropped (c_prev == 0).
        for blk, gate in enumerate((0, 2, 3)):
            gsl = slice(gate * H, (gate + 1) * H)
            W = W.at[:, blk * BW:blk * BW + H].set(wf[gsl, :].T)
            W = W.at[:, blk * BW + H:blk * BW + 2 * H].set(wb[gsl, :].T)
            b = b.at[blk * BW:blk * BW + H].set(bf[gsl])
            b = b.at[blk * BW + H:blk * BW + 2 * H].set(bb[gsl])
        return W, b

    w1, b1 = pack_layer("l0", input_size)                      # (I, GW), (GW,)
    w2, b2 = pack_layer("l1", 2 * H)                           # (2H, GW), (GW,)

    w1p = jnp.zeros((Ipad, GW), jnp.float32).at[:input_size, :].set(w1)
    w2p = jnp.zeros((BW, GW), jnp.float32).at[:2 * H, :].set(w2)

    wfc = jnp.zeros((BW, GW), jnp.float32)
    wfc = wfc.at[:2 * H, :output_size].set(params["fc_weight"].T)
    bfc = jnp.full((OP,), -jnp.inf, jnp.float32).at[:output_size].set(params["fc_bias"])
    for idx in zero_probs:
        bfc = bfc.at[idx].set(-jnp.inf)

    w_slab = jnp.concatenate([w1p, w2p, wfc], axis=0)          # (Ipad + 2*BW, GW)
    b_slab = jnp.concatenate([b1, b2, bfc]).reshape(1, -1)     # (1, 2*GW + OP)
    return w_slab, b_slab, (Ipad, BW, GW, OP)


def agent_forward(x, params, hidden_size, output_size, zero_probs=()):
    input_size = x.shape[-1]
    w_slab, b_slab, (Ipad, BW, GW, OP) = _pack_agent_params(
        params, input_size, hidden_size, output_size, zero_probs)

    x_pad = jnp.zeros((1, Ipad), jnp.float32).at[0, :input_size].set(
        x.astype(jnp.float32).reshape(-1))

    cost = pl.CostEstimate(
        flops=2 * (Ipad * GW + BW * GW + BW * OP),
        transcendentals=8 * BW + OP,
        bytes_accessed=4 * (Ipad + int(w_slab.size) + int(b_slab.size) + OP),
    )
    vmem = pl.BlockSpec(memory_space=pltpu.MemorySpace.VMEM)
    out = pl.pallas_call(
        functools.partial(_agent_kernel, Ipad, BW, GW, OP),
        out_shape=jax.ShapeDtypeStruct((1, OP), jnp.float32),
        in_specs=[vmem, vmem, vmem],
        out_specs=vmem,
        cost_estimate=cost,
    )(x_pad, w_slab, b_slab)
    return out[0, :output_size]                                # squeeze(0) -> (O,)


def agent_reference(x, params, hidden_size, output_size, zero_probs=()):
    """Pure-JAX reference of Agent.forward (seq_len == 1, zero initial state)."""
    H = hidden_size

    def cell(h_in, base):
        w = params[f"weight_ih_{base}"]
        b = params[f"bias_ih_{base}"] + params[f"bias_hh_{base}"]
        gates = h_in @ w.T + b
        i = jax.nn.sigmoid(gates[:, 0 * H:1 * H])
        g = jnp.tanh(gates[:, 2 * H:3 * H])
        o = jax.nn.sigmoid(gates[:, 3 * H:4 * H])
        return o * jnp.tanh(i * g)

    x2d = x.reshape(1, -1).astype(jnp.float32)
    h1 = jnp.concatenate([cell(x2d, "l0"), cell(x2d, "l0_reverse")], axis=1)
    h2 = jnp.concatenate([cell(h1, "l1"), cell(h1, "l1_reverse")], axis=1)
    logits = h2 @ params["fc_weight"].T + params["fc_bias"]
    for idx in zero_probs:
        logits = logits.at[0, idx].set(-jnp.inf)
    return jax.nn.softmax(logits, axis=1)[0]


if __name__ == "__main__":
    input_size, hidden_size, output_size = 16, 32, 8
    zero_probs = [2]

    key = jax.random.PRNGKey(0)
    pkey, xkey = jax.random.split(key)
    params = init_agent_params(pkey, input_size, hidden_size, output_size)
    x = jax.random.normal(xkey, (input_size,), dtype=jnp.float32)

    out = agent_forward(x, params, hidden_size, output_size, zero_probs)
    out = jax.block_until_ready(out)

    ref = agent_reference(x, params, hidden_size, output_size, zero_probs)
    assert out.shape == (output_size,)
    assert jnp.all(jnp.isfinite(out))
    assert float(out[2]) == 0.0                       # zero_probs class masked out
    assert jnp.allclose(out, ref, atol=1e-4, rtol=1e-4)
    assert jnp.allclose(jnp.sum(out), 1.0, atol=1e-5)

    print("KERNEL_OK")
</pallas_src>

<mosaic_0001>
module attributes {stable_mosaic.version = 11 : i64} {
  func.func @_agent_kernel(%arg0: memref<1x16xf32, #tpu.memory_space<vmem>>, %arg1: memref<272x384xf32, #tpu.memory_space<vmem>>, %arg2: memref<1x896xf32, #tpu.memory_space<vmem>>, %arg3: memref<1x128xf32, #tpu.memory_space<vmem>>) attributes {dimension_semantics = [], scalar_prefetch = 0 : i64, scratch_operands = 0 : i64, tpu.core_type = #tpu.core_type<tc>} {
    %c0 = arith.constant 0 : index
    %c0_0 = arith.constant 0 : index
    %0 = vector.load %arg0[%c0, %c0_0] : memref<1x16xf32, #tpu.memory_space<vmem>>, vector<1x16xf32>
    %c0_1 = arith.constant 0 : index
    %c0_2 = arith.constant 0 : index
    %1 = vector.load %arg1[%c0_1, %c0_2] : memref<272x384xf32, #tpu.memory_space<vmem>>, vector<16x384xf32>
    %c0_3 = arith.constant 0 : index
    %c0_4 = arith.constant 0 : index
    %2 = vector.load %arg2[%c0_3, %c0_4] : memref<1x896xf32, #tpu.memory_space<vmem>>, vector<1x384xf32>
    %cst = arith.constant dense<0.000000e+00> : vector<1x384xf32>
    %3 = tpu.matmul %0, %1, %cst {dimension_numbers = #tpu.dot_dimension_numbers<[1], [0], [0], [1], [0, 0, 1, 1], [], []>} : vector<1x16xf32>, vector<16x384xf32>, vector<1x384xf32> -> vector<1x384xf32>
    %4 = arith.addf %3, %2 : vector<1x384xf32>
    %5 = vector.extract_strided_slice %4 {offsets = [0, 0], sizes = [1, 128], strides = [1, 1]} : vector<1x384xf32> to vector<1x128xf32>
    %6 = arith.negf %5 : vector<1x128xf32>
    %7 = math.exp %6 : vector<1x128xf32>
    %cst_5 = arith.constant 1.000000e+00 : f32
    %8 = vector.broadcast %cst_5 : f32 to vector<1x128xf32>
    %9 = arith.addf %8, %7 : vector<1x128xf32>
    %10 = arith.divf %8, %9 : vector<1x128xf32>
    %11 = vector.extract_strided_slice %4 {offsets = [0, 128], sizes = [1, 128], strides = [1, 1]} : vector<1x384xf32> to vector<1x128xf32>
    %12 = math.tanh %11 : vector<1x128xf32>
    %13 = arith.mulf %10, %12 : vector<1x128xf32>
    %14 = vector.extract_strided_slice %4 {offsets = [0, 256], sizes = [1, 128], strides = [1, 1]} : vector<1x384xf32> to vector<1x128xf32>
    %15 = arith.negf %14 : vector<1x128xf32>
    %16 = math.exp %15 : vector<1x128xf32>
    %cst_6 = arith.constant 1.000000e+00 : f32
    %17 = vector.broadcast %cst_6 : f32 to vector<1x128xf32>
    %18 = arith.addf %17, %16 : vector<1x128xf32>
    %19 = arith.divf %17, %18 : vector<1x128xf32>
    %20 = math.tanh %13 : vector<1x128xf32>
    %21 = arith.mulf %19, %20 : vector<1x128xf32>
    %c16 = arith.constant 16 : index
    %c0_7 = arith.constant 0 : index
    %22 = vector.load %arg1[%c16, %c0_7] : memref<272x384xf32, #tpu.memory_space<vmem>>, vector<128x384xf32>
    %c0_8 = arith.constant 0 : index
    %c384 = arith.constant 384 : index
    %23 = vector.load %arg2[%c0_8, %c384] : memref<1x896xf32, #tpu.memory_space<vmem>>, vector<1x384xf32>
    %cst_9 = arith.constant dense<0.000000e+00> : vector<1x384xf32>
    %24 = tpu.matmul %21, %22, %cst_9 {dimension_numbers = #tpu.dot_dimension_numbers<[1], [0], [0], [1], [0, 0, 1, 1], [], []>} : vector<1x128xf32>, vector<128x384xf32>, vector<1x384xf32> -> vector<1x384xf32>
    %25 = arith.addf %24, %23 : vector<1x384xf32>
    %26 = vector.extract_strided_slice %25 {offsets = [0, 0], sizes = [1, 128], strides = [1, 1]} : vector<1x384xf32> to vector<1x128xf32>
    %27 = arith.negf %26 : vector<1x128xf32>
    %28 = math.exp %27 : vector<1x128xf32>
    %cst_10 = arith.constant 1.000000e+00 : f32
    %29 = vector.broadcast %cst_10 : f32 to vector<1x128xf32>
    %30 = arith.addf %29, %28 : vector<1x128xf32>
    %31 = arith.divf %29, %30 : vector<1x128xf32>
    %32 = vector.extract_strided_slice %25 {offsets = [0, 128], sizes = [1, 128], strides = [1, 1]} : vector<1x384xf32> to vector<1x128xf32>
    %33 = math.tanh %32 : vector<1x128xf32>
    %34 = arith.mulf %31, %33 : vector<1x128xf32>
    %35 = vector.extract_strided_slice %25 {offsets = [0, 256], sizes = [1, 128], strides = [1, 1]} : vector<1x384xf32> to vector<1x128xf32>
    %36 = arith.negf %35 : vector<1x128xf32>
    %37 = math.exp %36 : vector<1x128xf32>
    %cst_11 = arith.constant 1.000000e+00 : f32
    %38 = vector.broadcast %cst_11 : f32 to vector<1x128xf32>
    %39 = arith.addf %38, %37 : vector<1x128xf32>
    %40 = arith.divf %38, %39 : vector<1x128xf32>
    %41 = math.tanh %34 : vector<1x128xf32>
    %42 = arith.mulf %40, %41 : vector<1x128xf32>
    %c144 = arith.constant 144 : index
    %c0_12 = arith.constant 0 : index
    %43 = vector.load %arg1[%c144, %c0_12] : memref<272x384xf32, #tpu.memory_space<vmem>>, vector<128x128xf32>
    %cst_13 = arith.constant dense<0.000000e+00> : vector<1x128xf32>
    %44 = tpu.matmul %42, %43, %cst_13 {dimension_numbers = #tpu.dot_dimension_numbers<[1], [0], [0], [1], [0, 0, 1, 1], [], []>} : vector<1x128xf32>, vector<128x128xf32>, vector<1x128xf32> -> vector<1x128xf32>
    %c0_14 = arith.constant 0 : index
    %c768 = arith.constant 768 : index
    %45 = vector.load %arg2[%c0_14, %c768] : memref<1x896xf32, #tpu.memory_space<vmem>>, vector<1x128xf32>
    %46 = arith.addf %44, %45 : vector<1x128xf32>
    %cst_15 = arith.constant dense<0xFF800000> : vector<1xf32>
    %47 = vector.multi_reduction <maximumf>, %46, %cst_15 [1] : vector<1x128xf32> to vector<1xf32>
    %48 = vector.shape_cast %47 : vector<1xf32> to vector<1x1xf32>
    %49 = vector.broadcast %48 : vector<1x1xf32> to vector<1x128xf32>
    %50 = arith.subf %46, %49 : vector<1x128xf32>
    %51 = math.exp %50 : vector<1x128xf32>
    %cst_16 = arith.constant dense<0.000000e+00> : vector<1xf32>
    %52 = vector.multi_reduction <add>, %51, %cst_16 [1] : vector<1x128xf32> to vector<1xf32>
    %53 = vector.shape_cast %52 : vector<1xf32> to vector<1x1xf32>
    %54 = vector.broadcast %53 : vector<1x1xf32> to vector<1x128xf32>
    %55 = arith.divf %51, %54 : vector<1x128xf32>
    %c0_17 = arith.constant 0 : index
    %c0_18 = arith.constant 0 : index
    %56 = vector.load %arg3[%c0_17, %c0_18] : memref<1x128xf32, #tpu.memory_space<vmem>>, vector<1x128xf32>
    tpu.vector_store %arg3[%c0_17, %c0_18], %55 {strides = array<i32>} : memref<1x128xf32, #tpu.memory_space<vmem>>, vector<1x128xf32>,
    return
  }
}

</mosaic_0001>

<bundles_post_ra>
// kernel: tpu_custom_call.1
= control target key start
LH: loop header
LB: loop body
LE: loop exit
PB: predicated region body
PF: predicated region fallthrough
CT: control target
= control target key end

     0   :  { %8 = vsyncpa [#allocation3], 0  ;;  %s604_s0 = inlined_call_operand.hbm [shape: f32[1,16], index: 0, kind: input, shape index: {}]   ;;  %s605_s1 = inlined_call_operand.hbm [shape: f32[272,384], index: 1, kind: input, shape index: {}]   ;;  %s606_s2 = inlined_call_operand.hbm [shape: f32[1,896], index: 2, kind: input, shape index: {}]   ;;  %s607_s3 = inlined_call_operand.hbm [shape: f32[1,128], index: 3, kind: output, shape index: {}]  }
   0x1   :  { %9 = vsyncpa [#allocation6], 0  ;;  %s26_s14 = sshll.u32 %s605_s1, 4  ;;  %s27_s14 = int_to_ptr.hbm [resolvable:$true] %s26_s14 }
   0x2   :  { %10 = vsyncpa [#allocation4], 0  ;;  %s561_s15 = smov [#allocation5]   ;;  %s16_s19 = sshll.u32 %s604_s0, 4  ;;  %s17_s19 = int_to_ptr.hbm [resolvable:$true] %s16_s19 }
   0x3   :  { %s28_s16 = sshll.u32 %s561_s15, 4  ;;  %s562_s20 = smov 384   ;;  %s29_s16 = int_to_ptr.vmem [resolvable:$true] %s28_s16 }
   0x4   :  { %s563_s21 = smov 24   ;;  %s564_s22 = smov [#allocation2]  }
   0x5   :  { %34 = dma.hbm_to_vmem [thread:$0]  %s27_s14, 13056, %s29_s16, [#allocation6], %s562_s20, %s562_s20, %s563_s21  }
   0x6   :  { %s18_s23 = sshll.u32 %s564_s22, 4  ;;  %s40_s26 = sshll.u32 %s606_s2, 4  ;;  %s19_s23 = int_to_ptr.vmem [resolvable:$true] %s18_s23  ;;  %s41_s26 = int_to_ptr.hbm [resolvable:$true] %s40_s26 }
   0x7   :  { %21 = dma.hbm_to_vmem [thread:$0]  %s17_s19, 16, %s19_s23, [#allocation3]  }
   0x8   :  { %s565_s1 = smov [#allocation7]  }
   0x9   :  { %s42_s27 = sshll.u32 %s565_s1, 4  ;;  %s43_s27 = int_to_ptr.vmem [resolvable:$true] %s42_s27 }
   0xa   :  { %45 = dma.hbm_to_vmem [thread:$0]  %s41_s26, 112, %s43_s27, [#allocation6]  }
   0xb   :  { %555 = dma.done.wait [#allocation3], 16  }
   0xc   :  { %556 = vsyncadd [#allocation3], 4294967280 }
   0xd   :  { %557 = dma.done.wait [#allocation6], 13168  }
   0xe   :  { %558 = vsyncadd [#allocation6], 4294954128  ;;  %v62_v0 = vld [vmem:[#allocation5 + $0x18] sm:$0xff]  ;;  %v64_v1 = vld [vmem:[#allocation5 + $0x28] sm:$0xff]  ;;  %vm73_vm0 = vcmask 130048   ;;  %s566_s0 = smov [#allocation8]  }
   0xf   :  { %v59_v2 = vld [vmem:[#allocation5] sm:$0xff]  ;;  %91 = vmatpush.msra.mxu0 %v62_v0  ;;  %131 = vmatpush.msra.mxu2 %v64_v1  ;;  %v61_v3 = vld [vmem:[#allocation5 + $0x10] sm:$0xff]  ;;  %v58_v4 = vld [vmem:[#allocation2] sm:$0x1]  ;;  %s405_s2 = sshll.u32 %s566_s0, 4  ;;  %s407_s30 = sshll.u32 %s607_s3, 4  ;;  %s406_s2 = int_to_ptr.vmem [resolvable:$true] %s405_s2  ;;  %s408_s30 = int_to_ptr.hbm [resolvable:$true] %s407_s30 }
  0x10   :  { %v63_v5 = vld [vmem:[#allocation5 + $0x20] sm:$0xff]  ;;  %v60_v6 = vld [vmem:[#allocation5 + $0x8] sm:$0xff]  ;;  %v224_v7 = vld [vmem:[#allocation5 + $0x198] sm:$0xff] }
  0x11   :  { %111 = vmatpush.msra.mxu1 %v63_v5  ;;  %92 = vmatpush.msra.mxu0 %v59_v2  ;;  %v225_v8 = vld [vmem:[#allocation5 + $0x1a0] sm:$0xff]  ;;  %v226_v9 = vld [vmem:[#allocation5 + $0x1a8] sm:$0xff]  ;;  %v223_v12 = vld [vmem:[#allocation5 + $0x190] sm:$0xff] }
  0x12   :  { %132 = vmatpush.msra.mxu2 %v61_v3  ;;  %418 = vmatmul.msk.f32.vlgmr.msra.gmra.mxu0 %vm73_vm0, %v58_v4  ;;  %v221_v10 = vld [vmem:[#allocation5 + $0x180] sm:$0xff]  ;;  %v222_v11 = vld [vmem:[#allocation5 + $0x188] sm:$0xff]  ;;  %v219_v14 = vld [vmem:[#allocation5 + $0x170] sm:$0xff] }
  0x13   :  { %420 = vmatmul.msk.f32.vlgmr.msra.gmra.mxu2 %vm73_vm0, %v58_v4  ;;  %112 = vmatpush.msra.mxu1 %v60_v6  ;;  %v218_v13 = vld [vmem:[#allocation5 + $0x168] sm:$0xff]  ;;  %v220_v15 = vld [vmem:[#allocation5 + $0x178] sm:$0xff]  ;;  %v215_v16 = vld [vmem:[#allocation5 + $0x150] sm:$0xff] }
  0x14   :  { %419 = vmatmul.msk.f32.vlgmr.msra.gmra.mxu1 %vm73_vm0, %v58_v4  ;;  %235 = vmatpush.msra.mxu3 %v224_v7  ;;  %v216_v17 = vld [vmem:[#allocation5 + $0x158] sm:$0xff]  ;;  %v217_v18 = vld [vmem:[#allocation5 + $0x160] sm:$0xff]  ;;  %v214_v21 = vld [vmem:[#allocation5 + $0x148] sm:$0xff] }
  0x15   :  { %255 = vmatpush.msrb.mxu0 %v225_v8  ;;  %275 = vmatpush.msrb.mxu1 %v226_v9  ;;  %v212_v19 = vld [vmem:[#allocation5 + $0x138] sm:$0xff]  ;;  %v213_v20 = vld [vmem:[#allocation5 + $0x140] sm:$0xff]  ;;  %v210_v23 = vld [vmem:[#allocation5 + $0x128] sm:$0xff] }
  0x16   :  { %236 = vmatpush.msra.mxu3 %v221_v10  ;;  %v209_v22 = vld [vmem:[#allocation5 + $0x120] sm:$0xff]  ;;  %v211_v24 = vld [vmem:[#allocation5 + $0x130] sm:$0xff]  ;;  %v206_v25 = vld [vmem:[#allocation5 + $0x108] sm:$0xff] }
  0x17   :  { %256 = vmatpush.msrb.mxu0 %v222_v11  ;;  %276 = vmatpush.msrb.mxu1 %v223_v12  ;;  %v207_v26 = vld [vmem:[#allocation5 + $0x110] sm:$0xff]  ;;  %v208_v27 = vld [vmem:[#allocation5 + $0x118] sm:$0xff]  ;;  %v205_v30 = vld [vmem:[#allocation5 + $0x100] sm:$0xff] }
  0x18   :  { %237 = vmatpush.msra.mxu3 %v218_v13  ;;  %v203_v28 = vld [vmem:[#allocation5 + $0xf0] sm:$0xff]  ;;  %v204_v29 = vld [vmem:[#allocation5 + $0xf8] sm:$0xff]  ;;  %v201_v33 = vld [vmem:[#allocation5 + $0xe0] sm:$0xff] }
  0x19   :  { %257 = vmatpush.msrb.mxu0 %v219_v14  ;;  %277 = vmatpush.msrb.mxu1 %v220_v15  ;;  %v596_v31 = vld [vmem:[#allocation7] sm:$0x7]  ;;  %v200_v32 = vld [vmem:[#allocation5 + $0xd8] sm:$0xff]  ;;  %v202_v34 = vld [vmem:[#allocation5 + $0xe8] sm:$0xff] }
  0x1a   :  { %238 = vmatpush.msra.mxu3 %v215_v16  ;;  %v197_v35 = vld [vmem:[#allocation5 + $0xc0] sm:$0xff]  ;;  %v198_v36 = vld [vmem:[#allocation5 + $0xc8] sm:$0xff]  ;;  %v199_v37 = vld [vmem:[#allocation5 + $0xd0] sm:$0xff]  ;;  %v67_v38 = vperm.slane %v596_v31, 0  ;;  %v69_v53 = vperm.slane %v596_v31, 2  ;;  %v68_v2 = vperm.slane %v596_v31, 1 }
  0x1b   :  { %258 = vmatpush.msrb.mxu0 %v216_v17  ;;  %278 = vmatpush.msrb.mxu1 %v217_v18  ;;  %v194_v39 = vld [vmem:[#allocation5 + $0xa8] sm:$0xff]  ;;  %v195_v40 = vld [vmem:[#allocation5 + $0xb0] sm:$0xff]  ;;  %v196_v41 = vld [vmem:[#allocation5 + $0xb8] sm:$0xff] }
  0x1c   :  { %239 = vmatpush.msra.mxu3 %v212_v19  ;;  %v191_v43 = vld [vmem:[#allocation5 + $0x90] sm:$0xff]  ;;  %v192_v44 = vld [vmem:[#allocation5 + $0x98] sm:$0xff]  ;;  %v193_v45 = vld [vmem:[#allocation5 + $0xa0] sm:$0xff] }
  0x1d   :  { %259 = vmatpush.msrb.mxu0 %v213_v20  ;;  %279 = vmatpush.msrb.mxu1 %v214_v21  ;;  %v188_v47 = vld [vmem:[#allocation5 + $0x78] sm:$0xff]  ;;  %v189_v48 = vld [vmem:[#allocation5 + $0x80] sm:$0xff]  ;;  %v190_v49 = vld [vmem:[#allocation5 + $0x88] sm:$0xff] }
  0x1e   :  { %240 = vmatpush.msra.mxu3 %v209_v22  ;;  %v185_v50 = vld [vmem:[#allocation5 + $0x60] sm:$0xff]  ;;  %v186_v51 = vld [vmem:[#allocation5 + $0x68] sm:$0xff]  ;;  %v187_v54 = vld [vmem:[#allocation5 + $0x70] sm:$0xff] }
  0x1f   :  { %260 = vmatpush.msrb.mxu0 %v210_v23  ;;  %280 = vmatpush.msrb.mxu1 %v211_v24  ;;  %v182_v55 = vld [vmem:[#allocation5 + $0x48] sm:$0xff]  ;;  %v183_v56 = vld [vmem:[#allocation5 + $0x50] sm:$0xff]  ;;  %v184_v57 = vld [vmem:[#allocation5 + $0x58] sm:$0xff] }
  0x20   :  { %241 = vmatpush.msra.mxu3 %v206_v25  ;;  %v179_v59 = vld [vmem:[#allocation5 + $0x30] sm:$0xff]  ;;  %v180_v60 = vld [vmem:[#allocation5 + $0x38] sm:$0xff]  ;;  %v181_v62 = vld [vmem:[#allocation5 + $0x40] sm:$0xff] }
  0x21   :  { %261 = vmatpush.msrb.mxu0 %v207_v26  ;;  %281 = vmatpush.msrb.mxu1 %v208_v27  ;;  %v352_v31 = vld [vmem:[#allocation5 + $0x318] sm:$0xff] }
  0x22   :  { %242 = vmatpush.msra.mxu3 %v203_v28  ;;  %354 = vmatpush.msrb.mxu2 %v352_v31 }
  0x23   :  { %262 = vmatpush.msrb.mxu0 %v204_v29  ;;  %282 = vmatpush.msrb.mxu1 %v205_v30 }
  0x24   :  { %243 = vmatpush.msra.mxu3 %v200_v32  ;;  %v351_v32 = vld [vmem:[#allocation5 + $0x300] sm:$0xff] }
  0x25   :  { %263 = vmatpush.msrb.mxu0 %v201_v33  ;;  %283 = vmatpush.msrb.mxu1 %v202_v34  ;;  %v350_v33 = vld [vmem:[#allocation5 + $0x2e8] sm:$0xff]  ;;  %v349_v34 = vld [vmem:[#allocation5 + $0x2d0] sm:$0xff] }
  0x26   :  { %244 = vmatpush.msra.mxu3 %v197_v35  ;;  %355 = vmatpush.msrb.mxu2 %v351_v32  ;;  %v348_v35 = vld [vmem:[#allocation5 + $0x2b8] sm:$0xff] }
  0x27   :  { %264 = vmatpush.msrb.mxu0 %v198_v36  ;;  %284 = vmatpush.msrb.mxu1 %v199_v37  ;;  %v227_v36 = vld [vmem:[#allocation7 + $0x3] sm:$0x7]  ;;  %v347_v37 = vld [vmem:[#allocation5 + $0x2a0] sm:$0xff] }
  0x28   :  { %245 = vmatpush.msra.mxu3 %v194_v39  ;;  %356 = vmatpush.msrb.mxu2 %v350_v33  ;;  %v231_v39 = vperm.slane %v227_v36, 2 }
  0x29   :  { %265 = vmatpush.msrb.mxu0 %v195_v40  ;;  %285 = vmatpush.msrb.mxu1 %v196_v41  ;;  %v345_v40 = vld [vmem:[#allocation5 + $0x270] sm:$0xff]  ;;  %v344_v41 = vld [vmem:[#allocation5 + $0x258] sm:$0xff] }
  0x2a   :  { %246 = vmatpush.msra.mxu3 %v191_v43  ;;  %357 = vmatpush.msrb.mxu2 %v349_v34  ;;  %v343_v43 = vld [vmem:[#allocation5 + $0x240] sm:$0xff] }
  0x2b   :  { %266 = vmatpush.msrb.mxu0 %v192_v44  ;;  %286 = vmatpush.msrb.mxu1 %v193_v45  ;;  %v229_v45 = vperm.slane %v227_v36, 0 }
  0x2c   :  { %247 = vmatpush.msra.mxu3 %v188_v47  ;;  %358 = vmatpush.msrb.mxu2 %v348_v35 }
  0x2d   :  { %267 = vmatpush.msrb.mxu0 %v189_v48  ;;  %287 = vmatpush.msrb.mxu1 %v190_v49  ;;  %v341_v48 = vld [vmem:[#allocation5 + $0x210] sm:$0xff] }
  0x2e   :  { %248 = vmatpush.msra.mxu3 %v185_v50  ;;  %359 = vmatpush.msrb.mxu2 %v347_v37 }
  0x2f   :  { %268 = vmatpush.msrb.mxu0 %v186_v51  ;;  %288 = vmatpush.msrb.mxu1 %v187_v54  ;;  %v340_v51 = vld [vmem:[#allocation5 + $0x1f8] sm:$0xff]  ;;  %v338_v54 = vld [vmem:[#allocation5 + $0x1c8] sm:$0xff] }
  0x30   :  { %249 = vmatpush.msra.mxu3 %v182_v55 }
  0x31   :  { %269 = vmatpush.msrb.mxu0 %v183_v56  ;;  %289 = vmatpush.msrb.mxu1 %v184_v57  ;;  %v337_v57 = vld [vmem:[#allocation5 + $0x1b0] sm:$0xff] }
  0x32   :  { %250 = vmatpush.msra.mxu3 %v179_v59 }
  0x33   :  { %270 = vmatpush.msrb.mxu0 %v180_v60  ;;  %290 = vmatpush.msrb.mxu1 %v181_v62  ;;  %v230_v60 = vperm.slane %v227_v36, 1 }
  0x8f   :  { %v94_v42 = vpop.f32.mrf.mxu0 }
  0x90   :  { %v95_v46 = vadd.f32 %v94_v42, %v67_v38  ;;  %v346_v38 = vld [vmem:[#allocation5 + $0x288] sm:$0xff] }
  0x91   :  { %v114_v3 = vpop.f32.mrf.mxu1  ;;  %360 = vmatpush.msrb.mxu2 %v346_v38 }
  0x92   :  { %v421_v52 = vmul.f32 -1.442695, %v95_v46  ;;  %v115_v6 = vadd.f32 %v114_v3, %v68_v2  ;;  %v342_v46 = vld [vmem:[#allocation5 + $0x228] sm:$0xff] }
  0x93   :  { %361 = vmatpush.msrb.mxu2 %v345_v40 }
  0x94   :  { %431 = vpow2.f32 %v421_v52 }
  0x95   :  { %362 = vmatpush.msrb.mxu2 %v344_v41 }
  0x96   :  { %v134_v58 = vpop.f32.mrf.mxu2 }
  0x97   :  { %v135_v61 = vadd.f32 %v134_v58, %v69_v53  ;;  %363 = vmatpush.msrb.mxu2 %v343_v43  ;;  %v339_v53 = vld [vmem:[#allocation5 + $0x1e0] sm:$0xff] }
  0x99   :  { %v422_v63 = vmul.f32 -1.442695, %v135_v61  ;;  %364 = vmatpush.msrb.mxu2 %v342_v46 }
  0x9a   :  { %v432_v0 = vpop.eup %431 }
  0x9b   :  { %433 = vpow2.f32 %v422_v63  ;;  %v140_v1 = vadd.f32 1.0, %v432_v0  ;;  %365 = vmatpush.msrb.mxu2 %v341_v48 }
  0x9d   :  { %435 = vrcp.f32 %v140_v1  ;;  %v152_v10 = vand.u32 2147483648, %v140_v1  ;;  %v150_v12 = vand.u32 2147483647, %v140_v1  ;;  %vm146_vm2 = vweird.f32 %v140_v1  ;;  %366 = vmatpush.msrb.mxu2 %v340_v51 }
  0x9f   :  { %v153_v17 = vor.u32 1.1754944e-38, %v152_v10  ;;  %vm151_vm4 = vcmp.eq.f32.partialorder %v150_v12, 8.507059e+37  ;;  %367 = vmatpush.msrb.mxu2 %v339_v53 }
  0xa1   :  { %v434_v4 = vpop.eup %433  ;;  %368 = vmatpush.msrb.mxu2 %v338_v54 }
  0xa2   :  { %v161_v5 = vadd.f32 1.0, %v434_v4 }
  0xa3   :  { %v436_v7 = vpop.eup %435  ;;  %369 = vmatpush.msrb.mxu2 %v337_v57 }
  0xa4   :  { %437 = vrcp.f32 %v161_v5  ;;  %v142_v8 = vmul.f32 %v436_v7, %v140_v1  ;;  %vm147_vm1 = vweird.f32 %v436_v7  ;;  %v173_v24 = vand.u32 2147483648, %v161_v5 }
  0xa5   :  { %439 = vtanh.f32 %v115_v6  ;;  %vm148_vm3 = vmor %vm146_vm2, %vm147_vm1  ;;  %vm167_vm6 = vweird.f32 %v161_v5  ;;  %v171_v25 = vand.u32 2147483647, %v161_v5  ;;  %vm374_vm1 = vcmask 1040384  }
  0xa6   :  { %v143_v9 = vsub.f32 1.0, %v142_v8  ;;  %v174_v27 = vor.u32 1.1754944e-38, %v173_v24 }
  0xa7   :  { %vm172_vm8 = vcmp.eq.f32.partialorder %v171_v25, 8.507059e+37 }
  0xa8   :  { %v144_v11 = vmul.f32 %v436_v7, %v143_v9 }
  0xaa   :  { %v438_v13 = vpop.eup %437  ;;  %v145_v15 = vadd.f32 %v436_v7, %v144_v11 }
  0xab   :  { %v163_v14 = vmul.f32 %v438_v13, %v161_v5  ;;  %v440_v16 = vpop.eup %439  ;;  %vm168_vm5 = vweird.f32 %v438_v13 }
  0xac   :  { %v149_v18 = vsel %vm148_vm3, %v436_v7, %v145_v15  ;;  %vm169_vm7 = vmor %vm167_vm6, %vm168_vm5 }
  0xad   :  { %v164_v19 = vsub.f32 1.0, %v163_v14  ;;  %v154_v20 = vsel %vm151_vm4, %v153_v17, %v149_v18 }
  0xae   :  { %v157_v21 = vmul.f32 %v440_v16, %v154_v20 }
  0xaf   :  { %v165_v22 = vmul.f32 %v438_v13, %v164_v19 }
  0xb0   :  { %441 = vtanh.f32 %v157_v21 }
  0xb1   :  { %v166_v23 = vadd.f32 %v438_v13, %v165_v22 }
  0xb3   :  { %v170_v26 = vsel %vm169_vm7, %v438_v13, %v166_v23  ;;  %v353_v23 = vld [vmem:[#allocation7 + $0x6] sm:$0x1] }
  0xb4   :  { %v175_v29 = vsel %vm172_vm8, %v174_v27, %v170_v26 }
  0xb6   :  { %v442_v28 = vpop.eup %441 }
  0xb7   :  { %v178_v30 = vmul.f32 %v442_v28, %v175_v29 }
  0xb9   :  { %251 = vmatmul.f32.vlgmr.msra.gmra.mxu3 %v178_v30  ;;  %271 = vmatmul.f32.vlgmr.msrb.gmra.mxu0 %v178_v30 }
  0xba   :  { %291 = vmatmul.f32.vlgmr.msrb.gmra.mxu1 %v178_v30 }
 0x136   :  { %v272_v62 = vpop.f32.mrf.mxu0 }
 0x137   :  { %v292_v42 = vpop.f32.mrf.mxu1  ;;  %v273_v0 = vadd.f32 %v272_v62, %v230_v60 }
 0x138   :  { %v293_v44 = vadd.f32 %v292_v42, %v231_v39 }
 0x13a   :  { %v424_v47 = vmul.f32 -1.442695, %v293_v44 }
 0x13c   :  { %443 = vpow2.f32 %v424_v47  ;;  %v252_v49 = vpop.f32.mrf.mxu3 }
 0x13d   :  { %v253_v50 = vadd.f32 %v252_v49, %v229_v45 }
 0x13f   :  { %v423_v52 = vmul.f32 -1.442695, %v253_v50 }
 0x141   :  { %445 = vpow2.f32 %v423_v52 }
 0x142   :  { %v444_v55 = vpop.eup %443 }
 0x143   :  { %v319_v56 = vadd.f32 1.0, %v444_v55 }
 0x145   :  { %447 = vrcp.f32 %v319_v56  ;;  %v331_v16 = vand.u32 2147483648, %v319_v56  ;;  %vm325_vm14 = vweird.f32 %v319_v56  ;;  %v329_v17 = vand.u32 2147483647, %v319_v56 }
 0x147   :  { %v446_v58 = vpop.eup %445  ;;  %v332_v19 = vor.u32 1.1754944e-38, %v331_v16  ;;  %vm330_vm0 = vcmp.eq.f32.partialorder %v329_v17, 8.507059e+37 }
 0x148   :  { %v298_v59 = vadd.f32 1.0, %v446_v58 }
 0x14a   :  { %449 = vrcp.f32 %v298_v59  ;;  %v310_v4 = vand.u32 2147483648, %v298_v59  ;;  %v308_v7 = vand.u32 2147483647, %v298_v59  ;;  %vm304_vm10 = vweird.f32 %v298_v59 }
 0x14b   :  { %v448_v61 = vpop.eup %447  ;;  %451 = vtanh.f32 %v273_v0 }
 0x14c   :  { %v321_v1 = vmul.f32 %v448_v61, %v319_v56  ;;  %v311_v9 = vor.u32 1.1754944e-38, %v310_v4  ;;  %vm309_vm12 = vcmp.eq.f32.partialorder %v308_v7, 8.507059e+37  ;;  %vm326_vm13 = vweird.f32 %v448_v61 }
 0x14d   :  { %vm327_vm15 = vmor %vm325_vm14, %vm326_vm13 }
 0x14e   :  { %v322_v5 = vsub.f32 1.0, %v321_v1 }
 0x150   :  { %v450_v63 = vpop.eup %449  ;;  %v323_v10 = vmul.f32 %v448_v61, %v322_v5 }
 0x151   :  { %v300_v2 = vmul.f32 %v450_v63, %v298_v59  ;;  %vm305_vm9 = vweird.f32 %v450_v63  ;;  %v452_v12 = vpop.eup %451 }
 0x152   :  { %vm306_vm11 = vmor %vm304_vm10, %vm305_vm9  ;;  %v324_v15 = vadd.f32 %v448_v61, %v323_v10 }
 0x153   :  { %v301_v3 = vsub.f32 1.0, %v300_v2 }
 0x154   :  { %v328_v18 = vsel %vm327_vm15, %v448_v61, %v324_v15 }
 0x155   :  { %v302_v6 = vmul.f32 %v450_v63, %v301_v3  ;;  %v333_v21 = vsel %vm330_vm0, %v332_v19, %v328_v18 }
 0x157   :  { %v303_v8 = vadd.f32 %v450_v63, %v302_v6 }
 0x159   :  { %v307_v11 = vsel %vm306_vm11, %v450_v63, %v303_v8 }
 0x15a   :  { %v312_v13 = vsel %vm309_vm12, %v311_v9, %v307_v11 }
 0x15b   :  { %v315_v14 = vmul.f32 %v452_v12, %v312_v13 }
 0x15d   :  { %453 = vtanh.f32 %v315_v14 }
 0x163   :  { %v454_v20 = vpop.eup %453 }
 0x164   :  { %v336_v22 = vmul.f32 %v454_v20, %v333_v21 }
 0x166   :  { %370 = vmatmul.f32.vlgmr.msrb.gmra.mxu2 %v336_v22 }
 0x1e9   :  { %v371_v24 = vpop.f32.mrf.mxu2 }
 0x1ea   :  { %v372_v25 = vadd.f32 %v371_v24, %v353_v23 }
 0x1ec   :  { %v375_v26 = vsel %vm374_vm1, %v372_v25, -inf }
 0x1ed   :  { %376 = vmax.xlane.f32.xlu0 %v375_v26 }
 0x260   :  { %v377_v27 = vpop.xlane.xlu0 %376 }
 0x261   :  { %v378_v28 = vsub.f32 %v372_v25, %v377_v27 }
 0x263   :  { %v379_v29 = vmul.f32 1.442695, %v378_v28 }
 0x265   :  { %455 = vpow2.f32 %v379_v29 }
 0x26b   :  { %v456_v30 = vpop.eup %455 }
 0x26c   :  { %v381_v31 = vsel %vm374_vm1, %v456_v30, 0.0 }
 0x26d   :  { %382 = vadd.xlane.f32.xlu0 %v381_v31 }
 0x2e0   :  { %v383_v32 = vpop.xlane.xlu0 %382 }
 0x2e1   :  { %457 = vrcp.f32 %v383_v32  ;;  %v395_v36 = vand.u32 2147483648, %v383_v32  ;;  %v393_v38 = vand.u32 2147483647, %v383_v32  ;;  %vm389_vm3 = vweird.f32 %v383_v32 }
 0x2e3   :  { %v396_v40 = vor.u32 1.1754944e-38, %v395_v36  ;;  %vm394_vm5 = vcmp.eq.f32.partialorder %v393_v38, 8.507059e+37 }
 0x2e7   :  { %v458_v33 = vpop.eup %457 }
 0x2e8   :  { %v385_v34 = vmul.f32 %v458_v33, %v383_v32  ;;  %vm390_vm2 = vweird.f32 %v458_v33 }
 0x2e9   :  { %vm391_vm4 = vmor %vm389_vm3, %vm390_vm2 }
 0x2ea   :  { %v386_v35 = vsub.f32 1.0, %v385_v34 }
 0x2ec   :  { %v387_v37 = vmul.f32 %v458_v33, %v386_v35 }
 0x2ee   :  { %v388_v39 = vadd.f32 %v458_v33, %v387_v37 }
 0x2f0   :  { %v392_v41 = vsel %vm391_vm4, %v458_v33, %v388_v39 }
 0x2f1   :  { %v397_v42 = vsel %vm394_vm5, %v396_v40, %v392_v41 }
 0x2f2   :  { %v398_v43 = vmul.f32 %v456_v30, %v397_v42 }
 0x2f4   :  { %399 = vst [vmem:[#allocation8] sm:$0x1] %v398_v43 }
 0x2f5   :  { %410 = dma.vmem_to_hbm [thread:$0]  %s406_s2, 16, %s408_s30, [#allocation4]  }
 0x2f6   :  { %559 = dma.done.wait [#allocation4], 16  }
 0x2f7   :  { %560 = vsyncadd [#allocation4], 4294967280 }
 0x2f8   :  { %415 = vsyncpa [#allocation3], 1 }
 0x2f9   :  { %416 = vsyncpa [#allocation6], 1 }
 0x2fa   :  { %417 = vsyncpa [#allocation4], 1 }

</bundles_post_ra>
